<compile_context>
chip_gen: v7x
topology: tpu7x:2x2x1
jax: 0.10.0
libtpu: 0.0.40
codegen_flags: <defaults>
</compile_context>

<pallas_src>
import functools

import numpy as np
import jax
import jax.numpy as jnp
from jax.experimental import pallas as pl
from jax.experimental.pallas import tpu as pltpu


def _make_dense_light_kernel(x_ref, w1_ref, b1_ref, w2f_ref, b2_ref, mask_ref,
                             out_ref, stk_ref, *, W):
    # x_ref:    (1, Cin, HW)   channels on sublanes, flattened spatial on lanes
    # w1_ref:   (G, Cin)       torch conv1 weight (G, Cin, 1, 1) squeezed
    # b1_ref:   (G, 1)
    # w2f_ref:  (G, 9*G)       torch conv2 weight, columns ordered (tap, in_ch)
    # b2_ref:   (G, 1)
    # mask_ref: (9, 1, HW)     1.0 where the shifted read is in-bounds (zero pad)
    # out_ref:  (1, Cin+G, HW) cat(x, relu(conv2(relu(conv1(x)))))
    # stk_ref:  (9*G, HW) f32  scratch holding the 9 shifted copies of y
    Cin = x_ref.shape[1]
    G = w1_ref.shape[0]
    HW = x_ref.shape[2]

    x = x_ref[0]                                            # (Cin, HW)

    # ---- conv1 (1x1) + ReLU: one lane-dense channel matmul -----------------
    y = jnp.dot(w1_ref[...], x, preferred_element_type=jnp.float32)
    y = jnp.maximum(y + b1_ref[...], 0.0)                   # (G, HW)

    # ---- build the 9 shifted, zero-padded copies of y ----------------------
    # shifted_t[i, p] = y[i, p + dy*W + dx] when (h+dy, w+dx) is in-bounds,
    # else 0.  Roll is XLU work (free slot); the mask multiply is one VPU op;
    # the scratch writes are aligned, unmasked, lane-dense vsts (single pass).
    for kh in range(3):
        for kw in range(3):
            t = kh * 3 + kw
            dy, dx = kh - 1, kw - 1
            d = dy * W + dx
            if d == 0:
                shifted = y
            else:
                shifted = pltpu.roll(y, shift=(-d) % HW, axis=1) * mask_ref[t]
            stk_ref[t * G:(t + 1) * G, :] = shifted

    # ---- conv2 (3x3) + ReLU: single fused 9-tap channel matmul -------------
    out2 = jnp.dot(w2f_ref[...], stk_ref[...],
                   preferred_element_type=jnp.float32)
    out2 = jnp.maximum(out2 + b2_ref[...], 0.0)             # (G, HW)

    # ---- torch.cat((x, out), dim=1): two lane-dense sub-block stores -------
    out_ref[0, :Cin, :] = x.astype(out_ref.dtype)
    out_ref[0, Cin:, :] = out2.astype(out_ref.dtype)


def make_dense_light_pallas(x_nchw, w1, b1, w2, b2):
    """make_dense_light forward.

    x_nchw: (N, Cin, H, W)
    w1:     (G, Cin)      torch conv1.weight (G, Cin, 1, 1) squeezed
    b1:     (G,)
    w2:     (G, G, 3, 3)  torch conv2.weight (OIHW)
    b2:     (G,)
    returns (N, Cin+G, H, W) matching torch.cat((x, out), 1)
    """
    N, Cin, H, W = x_nchw.shape
    G = w1.shape[0]
    HW = H * W

    x = x_nchw.reshape(N, Cin, HW)                 # free reshape, no transpose
    # (O, I, kh, kw) -> (O, kh, kw, I) -> (O, 9*I): column index = tap*G + in_ch
    w2f = jnp.transpose(w2, (0, 2, 3, 1)).reshape(G, 9 * G)
    b1c = b1.reshape(G, 1)
    b2c = b2.reshape(G, 1)

    # Precomputed validity masks for the 9 taps (the 3x3 conv's zero padding).
    m = np.zeros((9, 1, HW), np.float32)
    for kh in range(3):
        for kw in range(3):
            dy, dx = kh - 1, kw - 1
            plane = np.zeros((H, W), np.float32)
            plane[max(0, -dy):H - max(0, dy), max(0, -dx):W - max(0, dx)] = 1.0
            m[kh * 3 + kw, 0] = plane.reshape(-1)
    mask = jnp.asarray(m)

    kernel = functools.partial(_make_dense_light_kernel, W=W)

    # TODO(synk): for large H*W, add a spatially-tiled grid axis with a one-row
    # halo so the working set fits v7x's 64 MiB VMEM and both v7x TensorCores
    # are used when N == 1.
    out = pl.pallas_call(
        kernel,
        out_shape=jax.ShapeDtypeStruct((N, Cin + G, HW), x_nchw.dtype),
        grid_spec=pltpu.PrefetchScalarGridSpec(
            num_scalar_prefetch=0,
            grid=(N,),
            in_specs=[
                pl.BlockSpec((1, Cin, HW), lambda n: (n, 0, 0)),
                pl.BlockSpec((G, Cin), lambda n: (0, 0)),
                pl.BlockSpec((G, 1), lambda n: (0, 0)),
                pl.BlockSpec((G, 9 * G), lambda n: (0, 0)),
                pl.BlockSpec((G, 1), lambda n: (0, 0)),
                pl.BlockSpec((9, 1, HW), lambda n: (0, 0, 0)),
            ],
            out_specs=pl.BlockSpec((1, Cin + G, HW), lambda n: (n, 0, 0)),
            scratch_shapes=[pltpu.VMEM((9 * G, HW), jnp.float32)],
        ),
        compiler_params=pltpu.CompilerParams(
            dimension_semantics=("parallel",)),
    )(x, w1, b1c, w2f, b2c, mask)

    return out.reshape(N, Cin + G, H, W)


def _reference(x, w1, b1, w2, b2):
    """Pure-JAX reference of the PyTorch forward (NCHW/OIHW, cross-correlation)."""
    y = jax.nn.relu(jnp.einsum('gc,nchw->nghw', w1, x)
                    + b1[None, :, None, None])
    z = jax.lax.conv_general_dilated(
        y, w2, window_strides=(1, 1), padding=((1, 1), (1, 1)),
        dimension_numbers=('NCHW', 'OIHW', 'NCHW'))
    z = jax.nn.relu(z + b2[None, :, None, None])
    return jnp.concatenate([x, z], axis=1)


if __name__ == "__main__":
    # Small shapes consistent with the module: nChannels=4, growthRate=8.
    N, Cin, H, W = 2, 4, 16, 16
    G = 8

    key = jax.random.PRNGKey(0)
    kx, k1, k2, k3, k4 = jax.random.split(key, 5)

    x = jax.random.normal(kx, (N, Cin, H, W), dtype=jnp.float32)

    # conv1: torch weight (G, Cin, 1, 1) -> stored squeezed as (G, Cin)
    w1 = 0.3 * jax.random.normal(k1, (G, Cin), dtype=jnp.float32)
    b1 = 0.1 * jax.random.normal(k2, (G,), dtype=jnp.float32)
    # conv2: torch weight (G, G, 3, 3) kept in OIHW
    w2 = 0.2 * jax.random.normal(k3, (G, G, 3, 3), dtype=jnp.float32)
    b2 = 0.1 * jax.random.normal(k4, (G,), dtype=jnp.float32)

    out = make_dense_light_pallas(x, w1, b1, w2, b2)
    out = jax.block_until_ready(out)

    ref = _reference(x, w1, b1, w2, b2)
    assert out.shape == (N, Cin + G, H, W), out.shape
    assert jnp.allclose(out, ref, atol=1e-4, rtol=1e-4), \
        float(jnp.max(jnp.abs(out - ref)))

    print("KERNEL_OK")
</pallas_src>

<mosaic_0001>
module attributes {stable_mosaic.version = 11 : i64} {
  func.func @_make_dense_light_kernel(%arg0: i32, %arg1: memref<1x4x256xf32, #tpu.memory_space<vmem>>, %arg2: memref<8x4xf32, #tpu.memory_space<vmem>>, %arg3: memref<8x1xf32, #tpu.memory_space<vmem>>, %arg4: memref<8x72xf32, #tpu.memory_space<vmem>>, %arg5: memref<8x1xf32, #tpu.memory_space<vmem>>, %arg6: memref<9x1x256xf32, #tpu.memory_space<vmem>>, %arg7: memref<1x12x256xf32, #tpu.memory_space<vmem>>, %arg8: memref<72x256xf32, #tpu.memory_space<vmem>>) attributes {dimension_semantics = [#tpu.dimension_semantics<parallel>], iteration_bounds = array<i64: 2>, scalar_prefetch = 0 : i64, scratch_operands = 1 : i64, tpu.core_type = #tpu.core_type<tc>, window_params = [{transform_indices = @transform_0, window_bounds = array<i64: 1, 4, 256>}, {pipeline_mode = #tpu.pipeline_mode<synchronous>, transform_indices = @transform_1, window_bounds = array<i64: 8, 4>}, {pipeline_mode = #tpu.pipeline_mode<synchronous>, transform_indices = @transform_2, window_bounds = array<i64: 8, 1>}, {pipeline_mode = #tpu.pipeline_mode<synchronous>, transform_indices = @transform_3, window_bounds = array<i64: 8, 72>}, {pipeline_mode = #tpu.pipeline_mode<synchronous>, transform_indices = @transform_4, window_bounds = array<i64: 8, 1>}, {pipeline_mode = #tpu.pipeline_mode<synchronous>, transform_indices = @transform_5, window_bounds = array<i64: 9, 1, 256>}, {transform_indices = @transform_6, window_bounds = array<i64: 1, 12, 256>}]} {
    %c0 = arith.constant 0 : index
    %c0_0 = arith.constant 0 : index
    %c0_1 = arith.constant 0 : index
    %0 = vector.load %arg1[%c0, %c0_0, %c0_1] : memref<1x4x256xf32, #tpu.memory_space<vmem>>, vector<1x4x256xf32>
    %1 = vector.shape_cast %0 : vector<1x4x256xf32> to vector<4x256xf32>
    %c0_2 = arith.constant 0 : index
    %c0_3 = arith.constant 0 : index
    %2 = vector.load %arg2[%c0_2, %c0_3] : memref<8x4xf32, #tpu.memory_space<vmem>>, vector<8x4xf32>
    %cst = arith.constant dense<0.000000e+00> : vector<8x256xf32>
    %3 = tpu.matmul %2, %1, %cst {dimension_numbers = #tpu.dot_dimension_numbers<[1], [0], [0], [1], [0, 0, 1, 1], [], []>} : vector<8x4xf32>, vector<4x256xf32>, vector<8x256xf32> -> vector<8x256xf32>
    %c0_4 = arith.constant 0 : index
    %c0_5 = arith.constant 0 : index
    %4 = vector.load %arg3[%c0_4, %c0_5] : memref<8x1xf32, #tpu.memory_space<vmem>>, vector<8x1xf32>
    %5 = vector.broadcast %4 : vector<8x1xf32> to vector<8x256xf32>
    %6 = arith.addf %3, %5 : vector<8x256xf32>
    %cst_6 = arith.constant 0.000000e+00 : f32
    %7 = vector.broadcast %cst_6 : f32 to vector<8x256xf32>
    %8 = arith.maximumf %6, %7 : vector<8x256xf32>
    %c17_i32 = arith.constant 17 : i32
    %9 = tpu.dynamic_rotate %8 by %c17_i32 dim 1 : vector<8x256xf32>, i32 -> vector<8x256xf32>
    %c0_7 = arith.constant 0 : index
    %c0_8 = arith.constant 0 : index
    %c0_9 = arith.constant 0 : index
    %10 = vector.load %arg6[%c0_7, %c0_8, %c0_9] : memref<9x1x256xf32, #tpu.memory_space<vmem>>, vector<1x1x256xf32>
    %11 = vector.shape_cast %10 : vector<1x1x256xf32> to vector<1x256xf32>
    %12 = vector.broadcast %11 : vector<1x256xf32> to vector<8x256xf32>
    %13 = arith.mulf %9, %12 : vector<8x256xf32>
    %c0_10 = arith.constant 0 : index
    %c0_11 = arith.constant 0 : index
    %14 = vector.load %arg8[%c0_10, %c0_11] : memref<72x256xf32, #tpu.memory_space<vmem>>, vector<8x256xf32>
    tpu.vector_store %arg8[%c0_10, %c0_11], %13 {strides = array<i32>} : memref<72x256xf32, #tpu.memory_space<vmem>>, vector<8x256xf32>,
    %c16_i32 = arith.constant 16 : i32
    %15 = tpu.dynamic_rotate %8 by %c16_i32 dim 1 : vector<8x256xf32>, i32 -> vector<8x256xf32>
    %c1 = arith.constant 1 : index
    %c0_12 = arith.constant 0 : index
    %c0_13 = arith.constant 0 : index
    %16 = vector.load %arg6[%c1, %c0_12, %c0_13] : memref<9x1x256xf32, #tpu.memory_space<vmem>>, vector<1x1x256xf32>
    %17 = vector.shape_cast %16 : vector<1x1x256xf32> to vector<1x256xf32>
    %18 = vector.broadcast %17 : vector<1x256xf32> to vector<8x256xf32>
    %19 = arith.mulf %15, %18 : vector<8x256xf32>
    %c8 = arith.constant 8 : index
    %c0_14 = arith.constant 0 : index
    %20 = vector.load %arg8[%c8, %c0_14] : memref<72x256xf32, #tpu.memory_space<vmem>>, vector<8x256xf32>
    tpu.vector_store %arg8[%c8, %c0_14], %19 {strides = array<i32>} : memref<72x256xf32, #tpu.memory_space<vmem>>, vector<8x256xf32>,
    %c15_i32 = arith.constant 15 : i32
    %21 = tpu.dynamic_rotate %8 by %c15_i32 dim 1 : vector<8x256xf32>, i32 -> vector<8x256xf32>
    %c2 = arith.constant 2 : index
    %c0_15 = arith.constant 0 : index
    %c0_16 = arith.constant 0 : index
    %22 = vector.load %arg6[%c2, %c0_15, %c0_16] : memref<9x1x256xf32, #tpu.memory_space<vmem>>, vector<1x1x256xf32>
    %23 = vector.shape_cast %22 : vector<1x1x256xf32> to vector<1x256xf32>
    %24 = vector.broadcast %23 : vector<1x256xf32> to vector<8x256xf32>
    %25 = arith.mulf %21, %24 : vector<8x256xf32>
    %c16 = arith.constant 16 : index
    %c0_17 = arith.constant 0 : index
    %26 = vector.load %arg8[%c16, %c0_17] : memref<72x256xf32, #tpu.memory_space<vmem>>, vector<8x256xf32>
    tpu.vector_store %arg8[%c16, %c0_17], %25 {strides = array<i32>} : memref<72x256xf32, #tpu.memory_space<vmem>>, vector<8x256xf32>,
    %c1_i32 = arith.constant 1 : i32
    %27 = tpu.dynamic_rotate %8 by %c1_i32 dim 1 : vector<8x256xf32>, i32 -> vector<8x256xf32>
    %c3 = arith.constant 3 : index
    %c0_18 = arith.constant 0 : index
    %c0_19 = arith.constant 0 : index
    %28 = vector.load %arg6[%c3, %c0_18, %c0_19] : memref<9x1x256xf32, #tpu.memory_space<vmem>>, vector<1x1x256xf32>
    %29 = vector.shape_cast %28 : vector<1x1x256xf32> to vector<1x256xf32>
    %30 = vector.broadcast %29 : vector<1x256xf32> to vector<8x256xf32>
    %31 = arith.mulf %27, %30 : vector<8x256xf32>
    %c24 = arith.constant 24 : index
    %c0_20 = arith.constant 0 : index
    %32 = vector.load %arg8[%c24, %c0_20] : memref<72x256xf32, #tpu.memory_space<vmem>>, vector<8x256xf32>
    tpu.vector_store %arg8[%c24, %c0_20], %31 {strides = array<i32>} : memref<72x256xf32, #tpu.memory_space<vmem>>, vector<8x256xf32>,
    %c32 = arith.constant 32 : index
    %c0_21 = arith.constant 0 : index
    %33 = vector.load %arg8[%c32, %c0_21] : memref<72x256xf32, #tpu.memory_space<vmem>>, vector<8x256xf32>
    tpu.vector_store %arg8[%c32, %c0_21], %8 {strides = array<i32>} : memref<72x256xf32, #tpu.memory_space<vmem>>, vector<8x256xf32>,
    %c255_i32 = arith.constant 255 : i32
    %34 = tpu.dynamic_rotate %8 by %c255_i32 dim 1 : vector<8x256xf32>, i32 -> vector<8x256xf32>
    %c5 = arith.constant 5 : index
    %c0_22 = arith.constant 0 : index
    %c0_23 = arith.constant 0 : index
    %35 = vector.load %arg6[%c5, %c0_22, %c0_23] : memref<9x1x256xf32, #tpu.memory_space<vmem>>, vector<1x1x256xf32>
    %36 = vector.shape_cast %35 : vector<1x1x256xf32> to vector<1x256xf32>
    %37 = vector.broadcast %36 : vector<1x256xf32> to vector<8x256xf32>
    %38 = arith.mulf %34, %37 : vector<8x256xf32>
    %c40 = arith.constant 40 : index
    %c0_24 = arith.constant 0 : index
    %39 = vector.load %arg8[%c40, %c0_24] : memref<72x256xf32, #tpu.memory_space<vmem>>, vector<8x256xf32>
    tpu.vector_store %arg8[%c40, %c0_24], %38 {strides = array<i32>} : memref<72x256xf32, #tpu.memory_space<vmem>>, vector<8x256xf32>,
    %c241_i32 = arith.constant 241 : i32
    %40 = tpu.dynamic_rotate %8 by %c241_i32 dim 1 : vector<8x256xf32>, i32 -> vector<8x256xf32>
    %c6 = arith.constant 6 : index
    %c0_25 = arith.constant 0 : index
    %c0_26 = arith.constant 0 : index
    %41 = vector.load %arg6[%c6, %c0_25, %c0_26] : memref<9x1x256xf32, #tpu.memory_space<vmem>>, vector<1x1x256xf32>
    %42 = vector.shape_cast %41 : vector<1x1x256xf32> to vector<1x256xf32>
    %43 = vector.broadcast %42 : vector<1x256xf32> to vector<8x256xf32>
    %44 = arith.mulf %40, %43 : vector<8x256xf32>
    %c48 = arith.constant 48 : index
    %c0_27 = arith.constant 0 : index
    %45 = vector.load %arg8[%c48, %c0_27] : memref<72x256xf32, #tpu.memory_space<vmem>>, vector<8x256xf32>
    tpu.vector_store %arg8[%c48, %c0_27], %44 {strides = array<i32>} : memref<72x256xf32, #tpu.memory_space<vmem>>, vector<8x256xf32>,
    %c240_i32 = arith.constant 240 : i32
    %46 = tpu.dynamic_rotate %8 by %c240_i32 dim 1 : vector<8x256xf32>, i32 -> vector<8x256xf32>
    %c7 = arith.constant 7 : index
    %c0_28 = arith.constant 0 : index
    %c0_29 = arith.constant 0 : index
    %47 = vector.load %arg6[%c7, %c0_28, %c0_29] : memref<9x1x256xf32, #tpu.memory_space<vmem>>, vector<1x1x256xf32>
    %48 = vector.shape_cast %47 : vector<1x1x256xf32> to vector<1x256xf32>
    %49 = vector.broadcast %48 : vector<1x256xf32> to vector<8x256xf32>
    %50 = arith.mulf %46, %49 : vector<8x256xf32>
    %c56 = arith.constant 56 : index
    %c0_30 = arith.constant 0 : index
    %51 = vector.load %arg8[%c56, %c0_30] : memref<72x256xf32, #tpu.memory_space<vmem>>, vector<8x256xf32>
    tpu.vector_store %arg8[%c56, %c0_30], %50 {strides = array<i32>} : memref<72x256xf32, #tpu.memory_space<vmem>>, vector<8x256xf32>,
    %c239_i32 = arith.constant 239 : i32
    %52 = tpu.dynamic_rotate %8 by %c239_i32 dim 1 : vector<8x256xf32>, i32 -> vector<8x256xf32>
    %c8_31 = arith.constant 8 : index
    %c0_32 = arith.constant 0 : index
    %c0_33 = arith.constant 0 : index
    %53 = vector.load %arg6[%c8_31, %c0_32, %c0_33] : memref<9x1x256xf32, #tpu.memory_space<vmem>>, vector<1x1x256xf32>
    %54 = vector.shape_cast %53 : vector<1x1x256xf32> to vector<1x256xf32>
    %55 = vector.broadcast %54 : vector<1x256xf32> to vector<8x256xf32>
    %56 = arith.mulf %52, %55 : vector<8x256xf32>
    %c64 = arith.constant 64 : index
    %c0_34 = arith.constant 0 : index
    %57 = vector.load %arg8[%c64, %c0_34] : memref<72x256xf32, #tpu.memory_space<vmem>>, vector<8x256xf32>
    tpu.vector_store %arg8[%c64, %c0_34], %56 {strides = array<i32>} : memref<72x256xf32, #tpu.memory_space<vmem>>, vector<8x256xf32>,
    %c0_35 = arith.constant 0 : index
    %c0_36 = arith.constant 0 : index
    %58 = vector.load %arg4[%c0_35, %c0_36] : memref<8x72xf32, #tpu.memory_space<vmem>>, vector<8x72xf32>
    %c0_37 = arith.constant 0 : index
    %c0_38 = arith.constant 0 : index
    %59 = vector.load %arg8[%c0_37, %c0_38] : memref<72x256xf32, #tpu.memory_space<vmem>>, vector<72x256xf32>
    %cst_39 = arith.constant dense<0.000000e+00> : vector<8x256xf32>
    %60 = tpu.matmul %58, %59, %cst_39 {dimension_numbers = #tpu.dot_dimension_numbers<[1], [0], [0], [1], [0, 0, 1, 1], [], []>} : vector<8x72xf32>, vector<72x256xf32>, vector<8x256xf32> -> vector<8x256xf32>
    %c0_40 = arith.constant 0 : index
    %c0_41 = arith.constant 0 : index
    %61 = vector.load %arg5[%c0_40, %c0_41] : memref<8x1xf32, #tpu.memory_space<vmem>>, vector<8x1xf32>
    %62 = vector.broadcast %61 : vector<8x1xf32> to vector<8x256xf32>
    %63 = arith.addf %60, %62 : vector<8x256xf32>
    %cst_42 = arith.constant 0.000000e+00 : f32
    %64 = vector.broadcast %cst_42 : f32 to vector<8x256xf32>
    %65 = arith.maximumf %63, %64 : vector<8x256xf32>
    %c0_43 = arith.constant 0 : index
    %c0_44 = arith.constant 0 : index
    %c0_45 = arith.constant 0 : index
    %66 = vector.load %arg7[%c0_43, %c0_44, %c0_45] : memref<1x12x256xf32, #tpu.memory_space<vmem>>, vector<1x4x256xf32>
    %67 = vector.shape_cast %66 : vector<1x4x256xf32> to vector<4x256xf32>
    %68 = vector.shape_cast %1 : vector<4x256xf32> to vector<1x4x256xf32>
    tpu.vector_store %arg7[%c0_43, %c0_44, %c0_45], %68 {strides = array<i32>} : memref<1x12x256xf32, #tpu.memory_space<vmem>>, vector<1x4x256xf32>,
    %c0_46 = arith.constant 0 : index
    %c4 = arith.constant 4 : index
    %c0_47 = arith.constant 0 : index
    %69 = vector.load %arg7[%c0_46, %c4, %c0_47] : memref<1x12x256xf32, #tpu.memory_space<vmem>>, vector<1x8x256xf32>
    %70 = vector.shape_cast %69 : vector<1x8x256xf32> to vector<8x256xf32>
    %71 = vector.shape_cast %65 : vector<8x256xf32> to vector<1x8x256xf32>
    tpu.vector_store %arg7[%c0_46, %c4, %c0_47], %71 {strides = array<i32>} : memref<1x12x256xf32, #tpu.memory_space<vmem>>, vector<1x8x256xf32>,
    return
  }
  func.func @transform_0(%arg0: i32) -> (i32, i32, i32) {
    %c0_i32 = arith.constant 0 : i32
    %c0_i32_0 = arith.constant 0 : i32
    %c0_i32_1 = arith.constant 0 : i32
    return %arg0, %c0_i32, %c0_i32_0 : i32, i32, i32
  }
  func.func @transform_1(%arg0: i32) -> (i32, i32) {
    %c0_i32 = arith.constant 0 : i32
    %c0_i32_0 = arith.constant 0 : i32
    %c0_i32_1 = arith.constant 0 : i32
    return %c0_i32, %c0_i32_0 : i32, i32
  }
  func.func @transform_2(%arg0: i32) -> (i32, i32) {
    %c0_i32 = arith.constant 0 : i32
    %c0_i32_0 = arith.constant 0 : i32
    %c0_i32_1 = arith.constant 0 : i32
    return %c0_i32, %c0_i32_0 : i32, i32
  }
  func.func @transform_3(%arg0: i32) -> (i32, i32) {
    %c0_i32 = arith.constant 0 : i32
    %c0_i32_0 = arith.constant 0 : i32
    %c0_i32_1 = arith.constant 0 : i32
    return %c0_i32, %c0_i32_0 : i32, i32
  }
  func.func @transform_4(%arg0: i32) -> (i32, i32) {
    %c0_i32 = arith.constant 0 : i32
    %c0_i32_0 = arith.constant 0 : i32
    %c0_i32_1 = arith.constant 0 : i32
    return %c0_i32, %c0_i32_0 : i32, i32
  }
  func.func @transform_5(%arg0: i32) -> (i32, i32, i32) {
    %c0_i32 = arith.constant 0 : i32
    %c0_i32_0 = arith.constant 0 : i32
    %c0_i32_1 = arith.constant 0 : i32
    %c0_i32_2 = arith.constant 0 : i32
    return %c0_i32, %c0_i32_0, %c0_i32_1 : i32, i32, i32
  }
  func.func @transform_6(%arg0: i32) -> (i32, i32, i32) {
    %c0_i32 = arith.constant 0 : i32
    %c0_i32_0 = arith.constant 0 : i32
    %c0_i32_1 = arith.constant 0 : i32
    return %arg0, %c0_i32, %c0_i32_0 : i32, i32, i32
  }
}

</mosaic_0001>

<bundles_post_ra>
// kernel: tpu_custom_call.1
= control target key start
LH: loop header
LB: loop body
LE: loop exit
PB: predicated region body
PF: predicated region fallthrough
CT: control target
= control target key end

     0   :  { %11 = vsyncpa [#allocation4], 0  ;;  %s894_s21 = smov 0   ;;  %s1061_s0 = inlined_call_operand.vmem [shape: f32[2,4,256], index: 0, kind: input, shape index: {}]   ;;  %s1062_s1 = inlined_call_operand.vmem [shape: f32[8,4], index: 1, kind: input, shape index: {}]   ;;  %s1063_s2 = inlined_call_operand.vmem [shape: f32[8,1], index: 2, kind: input, shape index: {}]   ;;  %s1064_s3 = inlined_call_operand.hbm [shape: f32[8,72], index: 3, kind: input, shape index: {}]   ;;  %s1065_s4 = inlined_call_operand.vmem [shape: f32[8,1], index: 4, kind: input, shape index: {}]   ;;  %s1066_s5 = inlined_call_operand.vmem [shape: f32[9,1,256], index: 5, kind: input, shape index: {}]   ;;  %s1067_s6 = inlined_call_operand.vmem [shape: f32[2,12,256], index: 6, kind: output, shape index: {}]  }
   0x1 LB: > { %s900_s22 = sadd.s32 4294967295, %s846_s21   ;;  %p736_p0 = scmp.ge.s32.totalorder %s846_s21, 1  ;;  %s846_s21 = sphi %s894_s21, %s17_s21  }
   0x2   : > { %p179_p1 = scmp.lt.s32.totalorder %s846_s21, 3  ;;  %p1068_p3 = scmp.eq.s32.totalorder %s900_s22, 0 }
   0x3   : > { %s848_s24 = smov [#allocation3]   ;;  %s808_s29 = scalar_lea.hbm %s1064_s3, 128 }
   0x4   : > { %p904_p2 = pnand %p736_p0, %p179_p1  ;;  %s198_s25 = sshll.u32 %s848_s24, 4  ;;  %s199_s25 = int_to_ptr.vmem [resolvable:$true] %s198_s25 }
   0x5   : > { %p809_p6 = scmp.ne.s32.totalorder %s1064_s3, %s808_s29  ;;  %p815_p10 = scmp.lt.u32.totalorder %s808_s29, %s1064_s3 }
   0x6   : > { %s1070_s23 = scalar_select %p904_p2, 1, 0 }
   0x7   : > { %p780_p4 = pneg %p904_p2 }
   0x9   : > { %p913_p5 = pnand %p1068_p3, %p780_p4 }
   0xb   : > { %p810_p7 = pneg %p913_p5 }
   0xd   : > { %p811_p8 = pnand %p810_p7, %p809_p6 }
   0xf   : > { %p812_p9 = pneg %p811_p8 }
  0x11   : > { %p817_p11 = pnand %p815_p10, %p812_p9 }
  0x13   : > { %820 = shalt.err (!%p817_p11)
}
  0x14   : > { %s821_s10 = scalar_lea.vmem %s199_s25, 128  ;;  %p829_p1 = scmp.lt.s32.totalorder %s199_s25, %s199_s25 }
  0x15   : > { %p822_p12 = scmp.ne.s32.totalorder %s199_s25, %s821_s10  ;;  %p830_p4 = scmp.lt.s32.totalorder %s821_s10, %s821_s10 }
  0x17   : > { %p824_p13 = pnand %p822_p12, %p810_p7  ;;  %p831_p3 = por %p830_p4, %p829_p1 }
  0x19   : > { %p825_p0 = pneg %p824_p13 }
  0x1b   : > { %p832_p2 = pnand %p831_p3, %p825_p0 }
  0x1d   : > { %835 = shalt.err (!%p832_p2)
}
  0x1e   : > { %783 = dma.hbm_to_vmem [thread:$0]  (!%p913_p5), %s1064_s3, 128, %s199_s25, [#allocation4]  }
  0x1f   : > { %p1072_p6 = scmp.ne.s32.totalorder %s1070_s23, 0 }
  0x20   : > { %p1073_p8 = scmp.eq.s32.totalorder (!%p1072_p6), %s900_s22, 0 }
  0x21   : > { %225 = sbr.rel (%p1072_p6) target bundleno = 637 (0x27d), region = 44 }
  0x28   : > { %841 = dma.done.wait (%p1073_p8), [#allocation4], 128   ;;  %p1074_p7 = pmov %p1073_p8 }
  0x29   : > { %p255_p9 = scmp.lt.s32.totalorder %s900_s22, 1  ;;  %v849_v0 = vmov 0.0   ;;  %v850_v1 = vmov 0   ;;  %vm279_vm0 = vcmask 1043456   ;;  %v267_v3 = vld [vmem:[%s1063_s2] sm:$0xff]  ;;  %vm275_vm1 = vcmask 31744  }
  0x2a   : > { %843 = vsyncadd (%p1074_p7), [#allocation4], 4294967168  ;;  %348 = vmatprep.mubr.f32.mxu0 %v849_v0  ;;  %645 = vmatprep.mubr.f32.mxu1 %v849_v0  ;;  %v266_v5 = vld [vmem:[%s1062_s1] sm:$0xff]  ;;  %s851_s26 = smov 16   ;;  %s852_s27 = smov 17   ;;  %v361_v14 = vlaneseq  ;;  %vm577_vm10 = vcmask 588800  }
  0x2b   : > { %s1076_s22 = smov (!%p255_p9, %s900_s22), 1  ;;  %805 = vset.pattern.permute.xlu0 %v850_v1  ;;  %806 = vset.pattern.permute.xlu1 %v850_v1  ;;  %s853_s28 = smov 15   ;;  %v571_v13 = vld [vmem:[%s1065_s4] sm:$0xff]  ;;  %v751_v33 = vld [vmem:[%s1066_s5 + $0xa] sm:$0x3] }
  0x2c   : > { %s758_s13 = sshll.u32 %s1076_s22, 3  ;;  %s759_s14 = sshll.u32 %s1076_s22, 5  ;;  %270 = vperm.xlu0 %805, %v267_v3   ;;  %v369_v17 = vshrl.u32 %v361_v14, 7  ;;  %v980_v18 = vand.u32 127, %v361_v14  ;;  %v748_v23 = vld [vmem:[%s1066_s5 + $0x2] sm:$0x3] }
  0x2d   : > { %s259_s17 = scalar_lea.vmem %s1061_s0, %s758_s13  ;;  %s947_s20 = scalar_lea.vmem %s1067_s6, %s759_s14  ;;  %v366_v24 = vld [vmem:[%s1066_s5] sm:$0x3]  ;;  %v750_v25 = vld [vmem:[%s1066_s5 + $0x6] sm:$0x3]  ;;  %v749_v28 = vld [vmem:[%s1066_s5 + $0x4] sm:$0x3] }
  0x2e   : > { %v265_v2 = vld [vmem:[%s259_s17] sm:$0xff]  ;;  %s854_s29 = smov 1   ;;  %s855_s30 = smov 127   ;;  %v982_v20 = vsub.s32 0, %v369_v17  ;;  %v984_v22 = vsub.s32 1, %v369_v17  ;;  %vm386_vm2 = vcmp.lt.s32.totalorder %v980_v18, 16 }
  0x2f   : > { %v274_v4 = vcombine.high %v265_v2, %v265_v2  ;;  %655 = vst [vmem:[%s947_s20] sm:$0xf] %v265_v2  ;;  %s856_s7 = smov 113   ;;  %s857_s8 = smov 112   ;;  %vm410_vm3 = vcmp.lt.s32.totalorder %v980_v18, 15  ;;  %vm363_vm4 = vcmp.lt.s32.totalorder %v980_v18, 17  ;;  %vm434_vm5 = vcmp.lt.s32.totalorder %v980_v18, 1 }
  0x30   : > { %s858_s9 = smov 111   ;;  %v395_v26 = vrot.slane %v748_v23, %v982_v20  ;;  %v399_v30 = vrot.slane %v748_v23, %v984_v22  ;;  %v371_v34 = vrot.slane %v366_v24, %v982_v20  ;;  %v447_v35 = vrot.slane %v750_v25, %v984_v22  ;;  %v752_v1 = vld [vmem:[%s1066_s5 + $0xc] sm:$0x3]  ;;  %v753_v3 = vld [vmem:[%s1066_s5 + $0xe] sm:$0x3] }
  0x31   : > { %745 = vmatprep.subr.msk.mxu0 %vm279_vm0, %v274_v4  ;;  %656 = vst [vmem:[%s947_s20 + $0x8] sm:$0xf] %v274_v4  ;;  %v375_v36 = vrot.slane %v366_v24, %v984_v22  ;;  %v423_v37 = vrot.slane %v749_v28, %v984_v22  ;;  %v443_v38 = vrot.slane %v750_v25, %v982_v20  ;;  %vm460_vm6 = vcmp.lt.s32.totalorder %v980_v18, 127 }
  0x32   : > { %746 = vmatpush1.msk.msra.mxu0 %vm279_vm0, %v265_v2  ;;  %v473_v42 = vrot.slane %v751_v33, %v984_v22  ;;  %v419_v52 = vrot.slane %v749_v28, %v982_v20  ;;  %v469_v60 = vrot.slane %v751_v33, %v982_v20  ;;  %vm484_vm7 = vcmp.lt.s32.totalorder %v980_v18, 113 }
  0x33   : > { %747 = vmatmul.mubr.msk.f32.vlgmr.msra.gmra.mrb[0].mxu0 %vm275_vm1, %v266_v5  ;;  %vm508_vm8 = vcmp.lt.s32.totalorder %v980_v18, 112  ;;  %v521_v14 = vrot.slane %v753_v3, %v984_v22  ;;  %vm532_vm9 = vcmp.lt.s32.totalorder %v980_v18, 111 }
  0xab   : > { %v271_v6 = vpop.permute.xlu0 %270 }
 0x106   : > { %v350_v7 = vpop.f32.mrb[0].mxu0 }
 0x107   : > { %v351_v8 = vadd.f32 %v350_v7, %v271_v6  ;;  %v352_v9 = vpop.f32.mrb[1].mxu0  ;;  %v493_v7 = vrot.slane %v752_v1, %v982_v20 }
 0x108   : > { %v353_v11 = vadd.f32 %v352_v9, %v271_v6 }
 0x109   : > { %v957_v10 = vmax.f32 %v351_v8, 0.0  ;;  %v497_v8 = vrot.slane %v752_v1, %v984_v22 }
 0x10a   : > { %v961_v12 = vmax.f32 %v353_v11, 0.0 }
 0x10b   : > { %382 = vrot.lane.b32.xlu1 %v957_v10, %s851_s26  ;;  %357 = vrot.lane.b32.xlu0 %v957_v10, %s852_s27 }
 0x10f   : > { %406 = vrot.lane.b32.xlu1 %v957_v10, %s853_s28  ;;  %384 = vrot.lane.b32.xlu0 %v961_v12, %s851_s26 }
 0x113   : > { %430 = vrot.lane.b32.xlu1 %v957_v10, %s854_s29  ;;  %408 = vrot.lane.b32.xlu0 %v961_v12, %s853_s28 }
 0x117   : > { %359 = vrot.lane.b32.xlu1 %v961_v12, %s852_s27  ;;  %432 = vrot.lane.b32.xlu0 %v961_v12, %s854_s29 }
 0x11b   : > { %456 = vrot.lane.b32.xlu1 %v957_v10, %s855_s30  ;;  %458 = vrot.lane.b32.xlu0 %v961_v12, %s855_s30 }
 0x11f   : > { %480 = vrot.lane.b32.xlu1 %v957_v10, %s856_s7  ;;  %482 = vrot.lane.b32.xlu0 %v961_v12, %s856_s7 }
 0x123   : > { %504 = vrot.lane.b32.xlu1 %v957_v10, %s857_s8  ;;  %506 = vrot.lane.b32.xlu0 %v961_v12, %s857_s8 }
 0x127   : > { %528 = vrot.lane.b32.xlu1 %v957_v10, %s858_s9  ;;  %530 = vrot.lane.b32.xlu0 %v961_v12, %s858_s9 }
 0x12b   : > { %574 = vperm.xlu1 %806, %v571_v13   ;;  %v517_v13 = vrot.slane %v753_v3, %v982_v20 }
 0x17d   : > { %v383_v15 = vpop.permute.xlu1 %382  ;;  %v358_v16 = vpop.permute.xlu0 %357 }
 0x181   : > { %v407_v19 = vpop.permute.xlu1 %406  ;;  %v385_v21 = vpop.permute.xlu0 %384 }
 0x182   : > { %v387_v31 = vsel %vm386_vm2, %v383_v15, %v385_v21  ;;  %v388_v32 = vsel %vm386_vm2, %v385_v21, %v383_v15  ;;  %v754_v15 = vld [vmem:[%s1066_s5 + $0x10] sm:$0x3] }
 0x183   : > { %v402_v39 = vmul.f32 %v395_v26, %v388_v32  ;;  %v403_v43 = vmul.f32 %v399_v30, %v387_v31  ;;  %v545_v25 = vrot.slane %v754_v15, %v984_v22 }
 0x185   : > { %v431_v27 = vpop.permute.xlu1 %430  ;;  %v409_v29 = vpop.permute.xlu0 %408 }
 0x186   : > { %v411_v44 = vsel %vm410_vm3, %v407_v19, %v409_v29  ;;  %v412_v53 = vsel %vm410_vm3, %v409_v29, %v407_v19 }
 0x187   : > { %v427_v54 = vmul.f32 %v423_v37, %v411_v44  ;;  %v426_v2 = vmul.f32 %v419_v52, %v412_v53  ;;  %v552_v37 = vld [vmem:[#allocation3] sm:$0xff] }
 0x189   : > { %v360_v40 = vpop.permute.xlu1 %359  ;;  %v433_v41 = vpop.permute.xlu0 %432 }
 0x18a   : > { %v364_v45 = vsel %vm363_vm4, %v358_v16, %v360_v40  ;;  %v365_v46 = vsel %vm363_vm4, %v360_v40, %v358_v16  ;;  %v435_v47 = vsel %vm434_vm5, %v431_v27, %v433_v41  ;;  %v436_v49 = vsel %vm434_vm5, %v433_v41, %v431_v27 }
 0x18b   : > { %v378_v48 = vmul.f32 %v371_v34, %v365_v46  ;;  %v451_v50 = vmul.f32 %v447_v35, %v435_v47  ;;  %v379_v51 = vmul.f32 %v375_v36, %v364_v45  ;;  %v450_v59 = vmul.f32 %v443_v38, %v436_v49 }
 0x18c   : > { %v541_v34 = vrot.slane %v754_v15, %v982_v20 }
 0x18d   : > { %v457_v55 = vpop.permute.xlu1 %456  ;;  %v459_v56 = vpop.permute.xlu0 %458  ;;  %v760_v57 = vpack.c.bf16 %v403_v43, %v379_v51  ;;  %v762_v58 = vpack.c.bf16 %v402_v39, %v378_v48  ;;  %v764_v0 = vpack.c.bf16 %v451_v50, %v427_v54  ;;  %v766_v9 = vpack.c.bf16 %v450_v59, %v426_v2 }
 0x18e   : > { %v462_v61 = vsel %vm460_vm6, %v459_v56, %v457_v55  ;;  %v461_v62 = vsel %vm460_vm6, %v457_v55, %v459_v56 }
 0x18f   : > { %v477_v63 = vmul.f32 %v473_v42, %v462_v61  ;;  %761 = vmatprep.subr.bf16.mxu1 %v760_v57  ;;  %v476_v6 = vmul.f32 %v469_v60, %v461_v62 }
 0x190   : > { %763 = vmatpush1.bf16.msra.mxu1 %v762_v58 }
 0x191   : > { %v481_v4 = vpop.permute.xlu1 %480  ;;  %765 = vmatprep.subr.bf16.mxu1 %v764_v0  ;;  %v483_v5 = vpop.permute.xlu0 %482  ;;  %v768_v11 = vpack.c.bf16 %v477_v63, %v961_v12  ;;  %v770_v24 = vpack.c.bf16 %v476_v6, %v957_v10 }
 0x192   : > { %v485_v16 = vsel %vm484_vm7, %v481_v4, %v483_v5  ;;  %v486_v17 = vsel %vm484_vm7, %v483_v5, %v481_v4 }
 0x193   : > { %v500_v26 = vmul.f32 %v493_v7, %v485_v16  ;;  %v501_v27 = vmul.f32 %v497_v8, %v486_v17 }
 0x194   : > { %767 = vmatpush1.bf16.msra.mxu1 %v766_v9 }
 0x195   : > { %v505_v19 = vpop.permute.xlu1 %504  ;;  %769 = vmatprep.subr.bf16.mxu1 %v768_v11  ;;  %v507_v21 = vpop.permute.xlu0 %506 }
 0x196   : > { %v509_v23 = vsel %vm508_vm8, %v505_v19, %v507_v21  ;;  %v510_v12 = vsel %vm508_vm8, %v507_v21, %v505_v19 }
 0x197   : > { %v524_v28 = vmul.f32 %v517_v13, %v509_v23  ;;  %v525_v29 = vmul.f32 %v521_v14, %v510_v12 }
 0x198   : > { %771 = vmatpush1.bf16.msra.mxu1 %v770_v24 }
 0x199   : > { %v529_v30 = vpop.permute.xlu1 %528  ;;  %v531_v31 = vpop.permute.xlu0 %530  ;;  %v772_v32 = vpack.c.bf16 %v525_v29, %v501_v27  ;;  %v774_v33 = vpack.c.bf16 %v524_v28, %v500_v26 }
 0x19a   : > { %v534_v35 = vsel %vm532_vm9, %v531_v31, %v529_v30  ;;  %v533_v36 = vsel %vm532_vm9, %v529_v30, %v531_v31 }
 0x19b   : > { %v549_v10 = vmul.f32 %v545_v25, %v534_v35  ;;  %773 = vmatprep.subr.bf16.mxu1 %v772_v32  ;;  %v548_v22 = vmul.f32 %v541_v34, %v533_v36 }
 0x19c   : > { %775 = vmatpush1.bf16.msra.mxu1 %v774_v33 }
 0x19d   : > { %597 = vmatprep.subr.mxu1 %v549_v10 }
 0x1a0   : > { %598 = vmatpush1.msra.mxu1 %v548_v22 }
 0x1a1   : > { %755 = vmatmul.mubr.msk.f32.vlgmr.msra.gmra.mrb[0].mxu1 %vm577_vm10, %v552_v37 }
 0x1aa   : > { %v575_v38 = vpop.permute.xlu1 %574 }
 0x274   : > { %v647_v39 = vpop.f32.mrb[0].mxu1 }
 0x275   : > { %v648_v20 = vadd.f32 %v647_v39, %v575_v38  ;;  %v649_v40 = vpop.f32.mrb[1].mxu1 }
 0x276   : > { %v650_v41 = vadd.f32 %v649_v40, %v575_v38 }
 0x277   : > { %v652_v42 = vmax.f32 %v648_v20, 0.0 }
 0x278   : > { %v653_v43 = vmax.f32 %v650_v41, 0.0 }
 0x279   : > { %v659_v18 = vrot.slane %v652_v42, 4 }
 0x27a   : > { %v660_v44 = vrot.slane %v653_v43, 4 }
 0x27b   : > { %663 = vst [vmem:[%s947_s20 + $0x10] ss:$-12 sps:$4 sm:$0xff] %v659_v18  }
 0x27c   : > { %664 = vst [vmem:[%s947_s20 + $0x18] ss:$-12 sps:$4 sm:$0xff] %v660_v44  }
 0x27d PF: > { %s17_s21 = sadd.s32 1, %s846_s21  }
 0x27e   : > { %p14_p2 = scmp.ge.s32.totalorder %s17_s21, 4  }
 0x280   :  { %16 = sbr.rel (!%p14_p2) target bundleno = 1 (0x1), region = 86 }
 0x287   :  { %688 = vsyncpa [#allocation4], 1 }
 0x288   :  { %690 = vsyncpa [#allocation4 + $0x1], 1 }

</bundles_post_ra>
